<compile_context>
chip_gen: v6e
topology: v6e:2x2x1
jax: 0.10.0
libtpu: 0.0.40
codegen_flags: <defaults>
</compile_context>

<pallas_src>
import functools

import jax
import jax.numpy as jnp
from jax.experimental import pallas as pl
from jax.experimental.pallas import tpu as pltpu

_LANE = 128
_SUBLANE = 8


def _round_up(v, m):
    return (v + m - 1) // m * m


def _leaky_relu(h, negative_slope=0.2):
    # Equivalent to where(h >= 0, h, slope*h) for 0 < slope < 1.
    return jnp.maximum(h, negative_slope * h)


def _pad2(a, rows, cols):
    return jnp.pad(a, ((0, rows - a.shape[0]), (0, cols - a.shape[1])))


def _vmem_budget_bytes():
    """~80% of this generation's physical VMEM (fallback: v7x's 64 MiB)."""
    try:
        cap = int(pltpu.get_tpu_info().vmem_capacity_bytes)
    except Exception:
        cap = 64 << 20
    return int(cap * 4 // 5)


def _choose_block_b(B, requested, sub, per_row_bytes, resident_bytes, vmem_cap):
    """Pick the batch tile from the VMEM budget, keeping the grid megacore-friendly."""
    budget = vmem_cap - resident_bytes - (4 << 20)  # headroom for compiler scratch
    fit = max(sub, budget // per_row_bytes) if budget > 0 else sub
    blk = max(sub, min(int(requested), int(fit)))
    # Keep >=2 grid steps (v7x has 2 TensorCores) when tiles can stay >=256 rows.
    half = _round_up(pl.cdiv(B, 2), sub)
    if half >= 256:
        blk = min(blk, half)
    # Never exceed the sublane-padded batch.
    blk = min(blk, _round_up(B, sub))
    # Sublane-align; prefer 256-row (MXU pass) multiples when it adds no padding.
    blk = max(sub, (blk // sub) * sub)
    if blk > 256:
        blk256 = (blk // 256) * 256
        if _round_up(B, blk256) <= _round_up(B, blk):
            blk = blk256
    return int(blk)


def mlp_kernel(x_ref,
               w1_ref, b1_ref,
               w2_ref, b2_ref,
               w3_ref, b3_ref,
               w4_ref, b4_ref,
               o_ref):
    """Fused 4x(Linear) + 3x(LeakyReLU 0.2) forward on one batch tile."""
    cdt = w1_ref.dtype  # compute dtype fed to the MXU (bf16 or f32)
    # x arrives f32 from HBM; cast in-kernel (fused with the tile read).
    x = x_ref[...].astype(cdt)
    h = jnp.dot(x, w1_ref[...], preferred_element_type=jnp.float32) + b1_ref[...]
    h = _leaky_relu(h.astype(cdt))
    h = jnp.dot(h, w2_ref[...], preferred_element_type=jnp.float32) + b2_ref[...]
    h = _leaky_relu(h.astype(cdt))
    h = jnp.dot(h, w3_ref[...], preferred_element_type=jnp.float32) + b3_ref[...]
    h = _leaky_relu(h.astype(cdt))
    h = jnp.dot(h, w4_ref[...], preferred_element_type=jnp.float32) + b4_ref[...]
    o_ref[...] = h.astype(o_ref.dtype)


@functools.partial(jax.jit, static_argnames=("block_b", "compute_dtype"))
def mlp_forward(x, params, block_b=1024, compute_dtype=jnp.bfloat16):
    """Run the fused MLP kernel.

    x:              [B, nin] float32
    params:         dict with w1..w4 ([in, out]) and b1..b4 ([1, out]), f32
    block_b:        requested batch tile (rows per grid step); auto-clamped
    compute_dtype:  dtype fed to the MXU (bf16 default, f32 accumulation);
                    pass jnp.float32 for tight parity with the f32 reference
    """
    B, nin = x.shape
    nh = params["w1"].shape[1]
    nout = params["w4"].shape[1]
    out_dtype = x.dtype

    # Lane-pad hidden/output feature dims (zero padding keeps the math exact).
    nh_p = _round_up(nh, _LANE)
    nout_p = _round_up(nout, _LANE)

    csz = jnp.dtype(compute_dtype).itemsize
    osz = jnp.dtype(out_dtype).itemsize
    sub = 16 if csz < 4 else _SUBLANE  # bf16 packs 16 rows per vreg

    # Resident (grid-invariant) operand bytes.
    w_bytes = (nin * nh_p + 2 * nh_p * nh_p + nh_p * nout_p) * csz
    b_bytes = (3 * nh_p + nout_p) * 4
    # Per-batch-row VMEM bytes: x tile stays f32 (cast in-kernel) and is
    # double-buffered, out tile double-buffered, plus f32 intermediates.
    per_row = 2 * nin * 4 + 2 * nout_p * osz + 2 * nh_p * 4

    vmem_cap = _vmem_budget_bytes()
    block_b = _choose_block_b(B, block_b, sub, per_row, w_bytes + b_bytes, vmem_cap)
    b_p = _round_up(B, block_b)
    grid = (b_p // block_b,)

    # Host-side work on x is limited to optional batch padding — no cast,
    # no feature padding (fused into the kernel instead).
    xp = x if b_p == B else jnp.pad(x, ((0, b_p - B), (0, 0)))

    w1 = _pad2(params["w1"], nin, nh_p).astype(compute_dtype)
    w2 = _pad2(params["w2"], nh_p, nh_p).astype(compute_dtype)
    w3 = _pad2(params["w3"], nh_p, nh_p).astype(compute_dtype)
    w4 = _pad2(params["w4"], nh_p, nout_p).astype(compute_dtype)
    b1 = _pad2(params["b1"], 1, nh_p).astype(jnp.float32)
    b2 = _pad2(params["b2"], 1, nh_p).astype(jnp.float32)
    b3 = _pad2(params["b3"], 1, nh_p).astype(jnp.float32)
    b4 = _pad2(params["b4"], 1, nout_p).astype(jnp.float32)

    def x_map(i):
        return (i, 0)

    def rep_map(i):
        return (0, 0)

    def rep_spec(shape):
        # Grid-invariant operand (constant index_map): single-buffer it so it
        # does not pay 2x VMEM for a block that never changes.
        try:
            return pl.BlockSpec(shape, rep_map, pipeline_mode=pl.Buffered(1))
        except TypeError:  # older jax without pipeline_mode: default buffering
            return pl.BlockSpec(shape, rep_map)

    in_specs = [
        pl.BlockSpec((block_b, nin), x_map),
        rep_spec((nin, nh_p)), rep_spec((1, nh_p)),
        rep_spec((nh_p, nh_p)), rep_spec((1, nh_p)),
        rep_spec((nh_p, nh_p)), rep_spec((1, nh_p)),
        rep_spec((nh_p, nout_p)), rep_spec((1, nout_p)),
    ]
    out_specs = pl.BlockSpec((block_b, nout_p), x_map)

    # Static (python-int) VMEM estimate -> scoped-VMEM request with headroom,
    # capped per generation (~80% of physical VMEM).
    est = (w_bytes + b_bytes
           + 2 * block_b * nin * 4            # x double-buffered, f32 in VMEM
           + 2 * block_b * nout_p * osz       # out double-buffered
           + 2 * block_b * nh_p * 4)          # f32 intermediates / spills
    vmem_limit = int(min(vmem_cap, max(2 * est, 32 << 20)))

    flops = 2 * b_p * (nin * nh_p + 2 * nh_p * nh_p + nh_p * nout_p)
    bytes_accessed = b_p * nin * 4 + w_bytes + b_bytes + b_p * nout_p * osz
    cost = pl.CostEstimate(flops=flops, transcendentals=0,
                           bytes_accessed=bytes_accessed)

    out_p = pl.pallas_call(
        mlp_kernel,
        out_shape=jax.ShapeDtypeStruct((b_p, nout_p), out_dtype),
        grid_spec=pltpu.PrefetchScalarGridSpec(
            num_scalar_prefetch=0,
            grid=grid,
            in_specs=in_specs,
            out_specs=out_specs,
        ),
        compiler_params=pltpu.CompilerParams(
            dimension_semantics=("parallel",),
            vmem_limit_bytes=vmem_limit,
        ),
        cost_estimate=cost,
    )(xp, w1, b1, w2, b2, w3, b3, w4, b4)

    return out_p[:B, :nout]


def init_mlp_params(key, nin, nout, nh):
    """Deterministic init mirroring nn.Linear default: U(-1/sqrt(fan_in), ...).

    Weights are stored as [in_features, out_features] (i.e. PyTorch W.T);
    biases as [1, out_features].
    """
    dims = [(nin, nh), (nh, nh), (nh, nh), (nh, nout)]
    params = {}
    for idx, (fi, fo) in enumerate(dims, start=1):
        key, kw, kb = jax.random.split(key, 3)
        bound = 1.0 / jnp.sqrt(jnp.float32(fi))
        params[f"w{idx}"] = jax.random.uniform(
            kw, (fi, fo), jnp.float32, minval=-bound, maxval=bound)
        params[f"b{idx}"] = jax.random.uniform(
            kb, (1, fo), jnp.float32, minval=-bound, maxval=bound)
    return params


def mlp_reference(x, params):
    """Pure-JAX f32 reference (same math as the PyTorch module)."""
    h = x @ params["w1"] + params["b1"]
    h = jnp.where(h >= 0, h, 0.2 * h)
    h = h @ params["w2"] + params["b2"]
    h = jnp.where(h >= 0, h, 0.2 * h)
    h = h @ params["w3"] + params["b3"]
    h = jnp.where(h >= 0, h, 0.2 * h)
    return h @ params["w4"] + params["b4"]


if __name__ == "__main__":
    key = jax.random.PRNGKey(0)
    kx, kp, kx2, kp2 = jax.random.split(key, 4)

    # 1) Small shapes consistent with the module; f32 compute for a tight check.
    nin, nout, nh = 16, 8, 32
    batch = 8
    x = jax.random.normal(kx, (batch, nin), jnp.float32)
    params = init_mlp_params(kp, nin, nout, nh)

    out = jax.block_until_ready(mlp_forward(x, params, compute_dtype=jnp.float32))
    ref = mlp_reference(x, params)
    assert out.shape == (batch, nout)
    assert jnp.allclose(out, ref, atol=1e-5, rtol=1e-5)

    # 2) Larger, multi-tile grid (>=2 batch tiles -> both v7x TensorCores) with
    #    the default bf16 compute and f32 accumulation; looser tolerance vs f32.
    nin2, nout2, nh2 = 128, 128, 256
    batch2 = 512
    x2 = jax.random.normal(kx2, (batch2, nin2), jnp.float32)
    params2 = init_mlp_params(kp2, nin2, nout2, nh2)

    out2 = jax.block_until_ready(mlp_forward(x2, params2))
    ref2 = mlp_reference(x2, params2)
    assert out2.shape == (batch2, nout2)
    assert jnp.allclose(out2, ref2, atol=5e-2, rtol=5e-2)

    print("KERNEL_OK")
</pallas_src>

<mosaic_0001>
module attributes {stable_mosaic.version = 11 : i64} {
  func.func @mlp_kernel(%arg0: i32, %arg1: memref<8x16xf32, #tpu.memory_space<vmem>>, %arg2: memref<16x128xf32, #tpu.memory_space<vmem>>, %arg3: memref<1x128xf32, #tpu.memory_space<vmem>>, %arg4: memref<128x128xf32, #tpu.memory_space<vmem>>, %arg5: memref<1x128xf32, #tpu.memory_space<vmem>>, %arg6: memref<128x128xf32, #tpu.memory_space<vmem>>, %arg7: memref<1x128xf32, #tpu.memory_space<vmem>>, %arg8: memref<128x128xf32, #tpu.memory_space<vmem>>, %arg9: memref<1x128xf32, #tpu.memory_space<vmem>>, %arg10: memref<8x128xf32, #tpu.memory_space<vmem>>) attributes {dimension_semantics = [#tpu.dimension_semantics<parallel>], iteration_bounds = array<i64: 1>, scalar_prefetch = 0 : i64, scratch_operands = 0 : i64, tpu.core_type = #tpu.core_type<tc>, window_params = [{transform_indices = @transform_0, window_bounds = array<i64: 8, 16>}, {pipeline_mode = #tpu.pipeline_mode<synchronous>, transform_indices = @transform_1, window_bounds = array<i64: 16, 128>}, {pipeline_mode = #tpu.pipeline_mode<synchronous>, transform_indices = @transform_2, window_bounds = array<i64: 1, 128>}, {pipeline_mode = #tpu.pipeline_mode<synchronous>, transform_indices = @transform_3, window_bounds = array<i64: 128, 128>}, {pipeline_mode = #tpu.pipeline_mode<synchronous>, transform_indices = @transform_4, window_bounds = array<i64: 1, 128>}, {pipeline_mode = #tpu.pipeline_mode<synchronous>, transform_indices = @transform_5, window_bounds = array<i64: 128, 128>}, {pipeline_mode = #tpu.pipeline_mode<synchronous>, transform_indices = @transform_6, window_bounds = array<i64: 1, 128>}, {pipeline_mode = #tpu.pipeline_mode<synchronous>, transform_indices = @transform_7, window_bounds = array<i64: 128, 128>}, {pipeline_mode = #tpu.pipeline_mode<synchronous>, transform_indices = @transform_8, window_bounds = array<i64: 1, 128>}, {transform_indices = @transform_9, window_bounds = array<i64: 8, 128>}]} {
    %c0 = arith.constant 0 : index
    %c0_0 = arith.constant 0 : index
    %0 = vector.load %arg1[%c0, %c0_0] : memref<8x16xf32, #tpu.memory_space<vmem>>, vector<8x16xf32>
    %c0_1 = arith.constant 0 : index
    %c0_2 = arith.constant 0 : index
    %1 = vector.load %arg2[%c0_1, %c0_2] : memref<16x128xf32, #tpu.memory_space<vmem>>, vector<16x128xf32>
    %cst = arith.constant dense<0.000000e+00> : vector<8x128xf32>
    %2 = tpu.matmul %0, %1, %cst {dimension_numbers = #tpu.dot_dimension_numbers<[1], [0], [0], [1], [0, 0, 1, 1], [], []>} : vector<8x16xf32>, vector<16x128xf32>, vector<8x128xf32> -> vector<8x128xf32>
    %c0_3 = arith.constant 0 : index
    %c0_4 = arith.constant 0 : index
    %3 = vector.load %arg3[%c0_3, %c0_4] : memref<1x128xf32, #tpu.memory_space<vmem>>, vector<1x128xf32>
    %4 = vector.broadcast %3 : vector<1x128xf32> to vector<8x128xf32>
    %5 = arith.addf %2, %4 : vector<8x128xf32>
    %cst_5 = arith.constant 2.000000e-01 : f32
    %6 = vector.broadcast %cst_5 : f32 to vector<8x128xf32>
    %7 = arith.mulf %6, %5 : vector<8x128xf32>
    %8 = arith.maximumf %5, %7 : vector<8x128xf32>
    %c0_6 = arith.constant 0 : index
    %c0_7 = arith.constant 0 : index
    %9 = vector.load %arg4[%c0_6, %c0_7] : memref<128x128xf32, #tpu.memory_space<vmem>>, vector<128x128xf32>
    %cst_8 = arith.constant dense<0.000000e+00> : vector<8x128xf32>
    %10 = tpu.matmul %8, %9, %cst_8 {dimension_numbers = #tpu.dot_dimension_numbers<[1], [0], [0], [1], [0, 0, 1, 1], [], []>} : vector<8x128xf32>, vector<128x128xf32>, vector<8x128xf32> -> vector<8x128xf32>
    %c0_9 = arith.constant 0 : index
    %c0_10 = arith.constant 0 : index
    %11 = vector.load %arg5[%c0_9, %c0_10] : memref<1x128xf32, #tpu.memory_space<vmem>>, vector<1x128xf32>
    %12 = vector.broadcast %11 : vector<1x128xf32> to vector<8x128xf32>
    %13 = arith.addf %10, %12 : vector<8x128xf32>
    %cst_11 = arith.constant 2.000000e-01 : f32
    %14 = vector.broadcast %cst_11 : f32 to vector<8x128xf32>
    %15 = arith.mulf %14, %13 : vector<8x128xf32>
    %16 = arith.maximumf %13, %15 : vector<8x128xf32>
    %c0_12 = arith.constant 0 : index
    %c0_13 = arith.constant 0 : index
    %17 = vector.load %arg6[%c0_12, %c0_13] : memref<128x128xf32, #tpu.memory_space<vmem>>, vector<128x128xf32>
    %cst_14 = arith.constant dense<0.000000e+00> : vector<8x128xf32>
    %18 = tpu.matmul %16, %17, %cst_14 {dimension_numbers = #tpu.dot_dimension_numbers<[1], [0], [0], [1], [0, 0, 1, 1], [], []>} : vector<8x128xf32>, vector<128x128xf32>, vector<8x128xf32> -> vector<8x128xf32>
    %c0_15 = arith.constant 0 : index
    %c0_16 = arith.constant 0 : index
    %19 = vector.load %arg7[%c0_15, %c0_16] : memref<1x128xf32, #tpu.memory_space<vmem>>, vector<1x128xf32>
    %20 = vector.broadcast %19 : vector<1x128xf32> to vector<8x128xf32>
    %21 = arith.addf %18, %20 : vector<8x128xf32>
    %cst_17 = arith.constant 2.000000e-01 : f32
    %22 = vector.broadcast %cst_17 : f32 to vector<8x128xf32>
    %23 = arith.mulf %22, %21 : vector<8x128xf32>
    %24 = arith.maximumf %21, %23 : vector<8x128xf32>
    %c0_18 = arith.constant 0 : index
    %c0_19 = arith.constant 0 : index
    %25 = vector.load %arg8[%c0_18, %c0_19] : memref<128x128xf32, #tpu.memory_space<vmem>>, vector<128x128xf32>
    %cst_20 = arith.constant dense<0.000000e+00> : vector<8x128xf32>
    %26 = tpu.matmul %24, %25, %cst_20 {dimension_numbers = #tpu.dot_dimension_numbers<[1], [0], [0], [1], [0, 0, 1, 1], [], []>} : vector<8x128xf32>, vector<128x128xf32>, vector<8x128xf32> -> vector<8x128xf32>
    %c0_21 = arith.constant 0 : index
    %c0_22 = arith.constant 0 : index
    %27 = vector.load %arg9[%c0_21, %c0_22] : memref<1x128xf32, #tpu.memory_space<vmem>>, vector<1x128xf32>
    %28 = vector.broadcast %27 : vector<1x128xf32> to vector<8x128xf32>
    %29 = arith.addf %26, %28 : vector<8x128xf32>
    %c0_23 = arith.constant 0 : index
    %c0_24 = arith.constant 0 : index
    %30 = vector.load %arg10[%c0_23, %c0_24] : memref<8x128xf32, #tpu.memory_space<vmem>>, vector<8x128xf32>
    tpu.vector_store %arg10[%c0_23, %c0_24], %29 {strides = array<i32>} : memref<8x128xf32, #tpu.memory_space<vmem>>, vector<8x128xf32>,
    return
  }
  func.func @transform_0(%arg0: i32) -> (i32, i32) {
    %c0_i32 = arith.constant 0 : i32
    %c0_i32_0 = arith.constant 0 : i32
    return %arg0, %c0_i32 : i32, i32
  }
  func.func @transform_1(%arg0: i32) -> (i32, i32) {
    %c0_i32 = arith.constant 0 : i32
    %c0_i32_0 = arith.constant 0 : i32
    %c0_i32_1 = arith.constant 0 : i32
    return %c0_i32, %c0_i32_0 : i32, i32
  }
  func.func @transform_2(%arg0: i32) -> (i32, i32) {
    %c0_i32 = arith.constant 0 : i32
    %c0_i32_0 = arith.constant 0 : i32
    %c0_i32_1 = arith.constant 0 : i32
    return %c0_i32, %c0_i32_0 : i32, i32
  }
  func.func @transform_3(%arg0: i32) -> (i32, i32) {
    %c0_i32 = arith.constant 0 : i32
    %c0_i32_0 = arith.constant 0 : i32
    %c0_i32_1 = arith.constant 0 : i32
    return %c0_i32, %c0_i32_0 : i32, i32
  }
  func.func @transform_4(%arg0: i32) -> (i32, i32) {
    %c0_i32 = arith.constant 0 : i32
    %c0_i32_0 = arith.constant 0 : i32
    %c0_i32_1 = arith.constant 0 : i32
    return %c0_i32, %c0_i32_0 : i32, i32
  }
  func.func @transform_5(%arg0: i32) -> (i32, i32) {
    %c0_i32 = arith.constant 0 : i32
    %c0_i32_0 = arith.constant 0 : i32
    %c0_i32_1 = arith.constant 0 : i32
    return %c0_i32, %c0_i32_0 : i32, i32
  }
  func.func @transform_6(%arg0: i32) -> (i32, i32) {
    %c0_i32 = arith.constant 0 : i32
    %c0_i32_0 = arith.constant 0 : i32
    %c0_i32_1 = arith.constant 0 : i32
    return %c0_i32, %c0_i32_0 : i32, i32
  }
  func.func @transform_7(%arg0: i32) -> (i32, i32) {
    %c0_i32 = arith.constant 0 : i32
    %c0_i32_0 = arith.constant 0 : i32
    %c0_i32_1 = arith.constant 0 : i32
    return %c0_i32, %c0_i32_0 : i32, i32
  }
  func.func @transform_8(%arg0: i32) -> (i32, i32) {
    %c0_i32 = arith.constant 0 : i32
    %c0_i32_0 = arith.constant 0 : i32
    %c0_i32_1 = arith.constant 0 : i32
    return %c0_i32, %c0_i32_0 : i32, i32
  }
  func.func @transform_9(%arg0: i32) -> (i32, i32) {
    %c0_i32 = arith.constant 0 : i32
    %c0_i32_0 = arith.constant 0 : i32
    return %arg0, %c0_i32 : i32, i32
  }
}

</mosaic_0001>

<bundles_post_ra>
// kernel: mlp_forward.1
= control target key start
LH: loop header
LB: loop body
LE: loop exit
PB: predicated region body
PF: predicated region fallthrough
CT: control target
= control target key end

     0   :  { %v613_v1 = vmov 0.0   ;;  %vm614_vm0 = vmmov 0   ;;  %vm43_vm1 = vcmask 130048   ;;  %s892_s0 = inlined_call_operand.vmem [shape: f32[8,16], index: 0, kind: input, shape index: {}]   ;;  %s893_s1 = inlined_call_operand.vmem [shape: f32[16,128], index: 1, kind: input, shape index: {}]   ;;  %s894_s2 = inlined_call_operand.vmem [shape: f32[1,128], index: 2, kind: input, shape index: {}]   ;;  %s895_s3 = inlined_call_operand.vmem [shape: f32[128,128], index: 3, kind: input, shape index: {}]   ;;  %s896_s4 = inlined_call_operand.vmem [shape: f32[1,128], index: 4, kind: input, shape index: {}]   ;;  %s897_s5 = inlined_call_operand.vmem [shape: f32[128,128], index: 5, kind: input, shape index: {}]   ;;  %s898_s6 = inlined_call_operand.vmem [shape: f32[1,128], index: 6, kind: input, shape index: {}]   ;;  %s899_s7 = inlined_call_operand.vmem [shape: f32[128,128], index: 7, kind: input, shape index: {}]   ;;  %s900_s8 = inlined_call_operand.vmem [shape: f32[1,128], index: 8, kind: input, shape index: {}]   ;;  %s901_s9 = inlined_call_operand.hbm [shape: f32[8,128], index: 9, kind: output, shape index: {}]  }
   0x1   :  { %v35_v0 = vld [vmem:[%s893_s1 + $0x8] sm:$0xff]  ;;  %476 = vmatprep.subr.mxu0 %v613_v1  ;;  %v34_v2 = vld [vmem:[%s893_s1] sm:$0xff]  ;;  %480 = vmatprep.mubr.msk.f32.mxu0 %vm614_vm0, %v613_v1  ;;  %v134_v3 = vld [vmem:[%s895_s3 + $0x78] sm:$0xff] }
   0x2   :  { %477 = vmatpush3.msra.mxu0 %v35_v0  ;;  %v33_v4 = vld [vmem:[%s892_s0] sm:$0xff]  ;;  %483 = vmatprep.subr.mxu1 %v613_v1  ;;  %v133_v5 = vld [vmem:[%s895_s3 + $0x70] sm:$0xff]  ;;  %v132_v6 = vld [vmem:[%s895_s3 + $0x68] sm:$0xff] }
   0x3   :  { %478 = vmatprep.subr.mxu0 %v613_v1  ;;  %484 = vmatpush3.msra.mxu1 %v134_v3 }
   0x4   :  { %479 = vmatpush3.msra.mxu0 %v34_v2  ;;  %485 = vmatprep.subr.mxu1 %v613_v1 }
   0x5   :  { %481 = vmatmul.mubr.msk.f32.vlgmr.msra.gmra.mxu0 %vm43_vm1, %v33_v4  ;;  %486 = vmatpush3.msra.mxu1 %v133_v5 }
   0x6   :  { %14 = vsyncpa [#allocation3], 0  ;;  %487 = vmatprep.subr.mxu1 %v613_v1  ;;  %v131_v7 = vld [vmem:[%s895_s3 + $0x60] sm:$0xff]  ;;  %515 = vmatprep.mubr.msk.f32.mxu1 %vm614_vm0, %v613_v1  ;;  %v130_v8 = vld [vmem:[%s895_s3 + $0x58] sm:$0xff]  ;;  %s615_s1 = smov [#allocation2]  }
   0x7   :  { %488 = vmatpush3.msra.mxu1 %v132_v6  ;;  %518 = vmatprep.subr.mxu0 %v613_v1  ;;  %v129_v9 = vld [vmem:[%s895_s3 + $0x50] sm:$0xff]  ;;  %v128_v10 = vld [vmem:[%s895_s3 + $0x48] sm:$0xff]  ;;  %v127_v11 = vld [vmem:[%s895_s3 + $0x40] sm:$0xff]  ;;  %s409_s19 = sshll.u32 %s615_s1, 4  ;;  %s410_s19 = int_to_ptr.vmem [resolvable:$true] %s409_s19 }
   0x8   :  { %489 = vmatprep.subr.mxu1 %v613_v1  ;;  %550 = vmatprep.mubr.msk.f32.mxu0 %vm614_vm0, %v613_v1  ;;  %v126_v12 = vld [vmem:[%s895_s3 + $0x38] sm:$0xff]  ;;  %v125_v13 = vld [vmem:[%s895_s3 + $0x30] sm:$0xff]  ;;  %v124_v14 = vld [vmem:[%s895_s3 + $0x28] sm:$0xff]  ;;  %p596_p1 = scmp.lt.s32.totalorder %s410_s19, %s410_s19 }
   0x9   :  { %490 = vmatpush3.msra.mxu1 %v131_v7  ;;  %v123_v15 = vld [vmem:[%s895_s3 + $0x20] sm:$0xff]  ;;  %v122_v16 = vld [vmem:[%s895_s3 + $0x18] sm:$0xff]  ;;  %v121_v17 = vld [vmem:[%s895_s3 + $0x10] sm:$0xff] }
   0xa   :  { %491 = vmatprep.subr.mxu1 %v613_v1  ;;  %v120_v18 = vld [vmem:[%s895_s3 + $0x8] sm:$0xff]  ;;  %v119_v19 = vld [vmem:[%s895_s3] sm:$0xff]  ;;  %v229_v20 = vld [vmem:[%s897_s5 + $0x78] sm:$0xff] }
   0xb   :  { %492 = vmatpush3.msra.mxu1 %v130_v8  ;;  %v228_v21 = vld [vmem:[%s897_s5 + $0x70] sm:$0xff]  ;;  %519 = vmatpush3.msra.mxu0 %v229_v20  ;;  %v227_v22 = vld [vmem:[%s897_s5 + $0x68] sm:$0xff]  ;;  %v226_v23 = vld [vmem:[%s897_s5 + $0x60] sm:$0xff] }
   0xc   :  { %493 = vmatprep.subr.mxu1 %v613_v1  ;;  %520 = vmatprep.subr.mxu0 %v613_v1  ;;  %v225_v24 = vld [vmem:[%s897_s5 + $0x58] sm:$0xff]  ;;  %v224_v25 = vld [vmem:[%s897_s5 + $0x50] sm:$0xff]  ;;  %v223_v26 = vld [vmem:[%s897_s5 + $0x48] sm:$0xff] }
   0xd   :  { %494 = vmatpush3.msra.mxu1 %v129_v9  ;;  %521 = vmatpush3.msra.mxu0 %v228_v21  ;;  %v222_v27 = vld [vmem:[%s897_s5 + $0x40] sm:$0xff]  ;;  %v221_v28 = vld [vmem:[%s897_s5 + $0x38] sm:$0xff]  ;;  %v220_v29 = vld [vmem:[%s897_s5 + $0x30] sm:$0xff] }
   0xe   :  { %495 = vmatprep.subr.mxu1 %v613_v1  ;;  %522 = vmatprep.subr.mxu0 %v613_v1  ;;  %v219_v30 = vld [vmem:[%s897_s5 + $0x28] sm:$0xff]  ;;  %v218_v31 = vld [vmem:[%s897_s5 + $0x20] sm:$0xff]  ;;  %v217_v38 = vld [vmem:[%s897_s5 + $0x18] sm:$0xff] }
   0xf   :  { %496 = vmatpush3.msra.mxu1 %v128_v10  ;;  %523 = vmatpush3.msra.mxu0 %v227_v22  ;;  %v417_v32 = vld [vmem:[%s894_s2] ss:$0 sm:$0xff]  ;;  %v216_v39 = vld [vmem:[%s897_s5 + $0x10] sm:$0xff]  ;;  %v215_v40 = vld [vmem:[%s897_s5 + $0x8] sm:$0xff] }
  0x10   :  { %497 = vmatprep.subr.mxu1 %v613_v1  ;;  %524 = vmatprep.subr.mxu0 %v613_v1  ;;  %v214_v41 = vld [vmem:[%s897_s5] sm:$0xff]  ;;  %v324_v42 = vld [vmem:[%s899_s7 + $0x78] sm:$0xff]  ;;  %v323_v43 = vld [vmem:[%s899_s7 + $0x70] sm:$0xff] }
  0x11   :  { %498 = vmatpush3.msra.mxu1 %v127_v11  ;;  %525 = vmatpush3.msra.mxu0 %v226_v23  ;;  %v322_v44 = vld [vmem:[%s899_s7 + $0x68] sm:$0xff]  ;;  %v321_v45 = vld [vmem:[%s899_s7 + $0x60] sm:$0xff]  ;;  %v320_v46 = vld [vmem:[%s899_s7 + $0x58] sm:$0xff] }
  0x12   :  { %499 = vmatprep.subr.mxu1 %v613_v1  ;;  %526 = vmatprep.subr.mxu0 %v613_v1  ;;  %v319_v47 = vld [vmem:[%s899_s7 + $0x50] sm:$0xff]  ;;  %v318_v48 = vld [vmem:[%s899_s7 + $0x48] sm:$0xff]  ;;  %v317_v49 = vld [vmem:[%s899_s7 + $0x40] sm:$0xff] }
  0x13   :  { %500 = vmatpush3.msra.mxu1 %v126_v12  ;;  %527 = vmatpush3.msra.mxu0 %v225_v24  ;;  %v316_v50 = vld [vmem:[%s899_s7 + $0x38] sm:$0xff]  ;;  %v315_v51 = vld [vmem:[%s899_s7 + $0x30] sm:$0xff]  ;;  %v314_v52 = vld [vmem:[%s899_s7 + $0x28] sm:$0xff] }
  0x14   :  { %501 = vmatprep.subr.mxu1 %v613_v1  ;;  %528 = vmatprep.subr.mxu0 %v613_v1  ;;  %v313_v53 = vld [vmem:[%s899_s7 + $0x20] sm:$0xff]  ;;  %v312_v60 = vld [vmem:[%s899_s7 + $0x18] sm:$0xff]  ;;  %v311_v61 = vld [vmem:[%s899_s7 + $0x10] sm:$0xff] }
  0x15   :  { %502 = vmatpush3.msra.mxu1 %v125_v13  ;;  %529 = vmatpush3.msra.mxu0 %v224_v25  ;;  %v419_v54 = vld [vmem:[%s896_s4] ss:$0 sm:$0xff]  ;;  %v310_v62 = vld [vmem:[%s899_s7 + $0x8] sm:$0xff] }
  0x16   :  { %503 = vmatprep.subr.mxu1 %v613_v1  ;;  %530 = vmatprep.subr.mxu0 %v613_v1  ;;  %v309_v63 = vld [vmem:[%s899_s7] sm:$0xff]  ;;  %s591_s7 = scalar_lea.vmem %s410_s19, 128 }
  0x17   :  { %504 = vmatpush3.msra.mxu1 %v124_v14  ;;  %531 = vmatpush3.msra.mxu0 %v223_v26  ;;  %v420_v0 = vld [vmem:[%s898_s6] ss:$0 sm:$0xff]  ;;  %p592_p0 = scmp.ne.s32.totalorder %s410_s19, %s591_s7  ;;  %p597_p2 = scmp.lt.s32.totalorder %s591_s7, %s591_s7 }
  0x18   :  { %505 = vmatprep.subr.mxu1 %v613_v1  ;;  %532 = vmatprep.subr.mxu0 %v613_v1  ;;  %v421_v7 = vld [vmem:[%s900_s8] ss:$0 sm:$0xff] }
  0x19   :  { %506 = vmatpush3.msra.mxu1 %v123_v15  ;;  %533 = vmatpush3.msra.mxu0 %v222_v27  ;;  %p598_p3 = por %p597_p2, %p596_p1 }
  0x1a   :  { %507 = vmatprep.subr.mxu1 %v613_v1  ;;  %534 = vmatprep.subr.mxu0 %v613_v1 }
  0x1b   :  { %508 = vmatpush3.msra.mxu1 %v122_v16  ;;  %535 = vmatpush3.msra.mxu0 %v221_v28  ;;  %p599_p4 = pnand %p598_p3, %p592_p0 }
  0x1c   :  { %509 = vmatprep.subr.mxu1 %v613_v1  ;;  %536 = vmatprep.subr.mxu0 %v613_v1 }
  0x1d   :  { %510 = vmatpush3.msra.mxu1 %v121_v17  ;;  %537 = vmatpush3.msra.mxu0 %v220_v29 }
  0x1e   :  { %511 = vmatprep.subr.mxu1 %v613_v1  ;;  %538 = vmatprep.subr.mxu0 %v613_v1 }
  0x1f   :  { %512 = vmatpush3.msra.mxu1 %v120_v18  ;;  %539 = vmatpush3.msra.mxu0 %v219_v30 }
  0x20   :  { %513 = vmatprep.subr.mxu1 %v613_v1  ;;  %540 = vmatprep.subr.mxu0 %v613_v1 }
  0x21   :  { %514 = vmatpush3.msra.mxu1 %v119_v19  ;;  %541 = vmatpush3.msra.mxu0 %v218_v31 }
  0x22   :  { %553 = vmatprep.subr.mxu1 %v613_v1  ;;  %542 = vmatprep.subr.mxu0 %v613_v1 }
  0x23   :  { %543 = vmatpush3.msra.mxu0 %v217_v38 }
  0x24   :  { %544 = vmatprep.subr.mxu0 %v613_v1 }
  0x25   :  { %545 = vmatpush3.msra.mxu0 %v216_v39 }
  0x26   :  { %546 = vmatprep.subr.mxu0 %v613_v1 }
  0x27   :  { %547 = vmatpush3.msra.mxu0 %v215_v40 }
  0x28   :  { %548 = vmatprep.subr.mxu0 %v613_v1 }
  0x29   :  { %549 = vmatpush3.msra.mxu0 %v214_v41 }
  0xc5   :  { %v113_v33 = vpop.f32.mrf.mxu0 }
  0xc6   :  { %v114_v34 = vadd.f32 %v417_v32, %v113_v33 }
  0xc7   :  { %v482_v35 = vpop.f32.mrf.mxu0 }
  0xc8   :  { %v117_v36 = vmul.f32 0.2, %v114_v34 }
  0xca   :  { %v118_v37 = vmax.f32 %v114_v34, %v117_v36 }
  0xcc   :  { %516 = vmatmul.mubr.f32.vlgmr.msra.gmra.mxu1 %v118_v37 }
  0xcd   :  { %585 = vmatprep.mubr.msk.f32.mxu1 %vm614_vm0, %v613_v1  ;;  %554 = vmatpush3.msra.mxu1 %v324_v42 }
  0xce   :  { %555 = vmatprep.subr.mxu1 %v613_v1 }
  0xcf   :  { %556 = vmatpush3.msra.mxu1 %v323_v43 }
  0xd0   :  { %557 = vmatprep.subr.mxu1 %v613_v1 }
  0xd1   :  { %558 = vmatpush3.msra.mxu1 %v322_v44 }
  0xd2   :  { %559 = vmatprep.subr.mxu1 %v613_v1 }
  0xd3   :  { %560 = vmatpush3.msra.mxu1 %v321_v45 }
  0xd4   :  { %561 = vmatprep.subr.mxu1 %v613_v1 }
  0xd5   :  { %562 = vmatpush3.msra.mxu1 %v320_v46 }
  0xd6   :  { %563 = vmatprep.subr.mxu1 %v613_v1 }
  0xd7   :  { %564 = vmatpush3.msra.mxu1 %v319_v47 }
  0xd8   :  { %565 = vmatprep.subr.mxu1 %v613_v1 }
  0xd9   :  { %566 = vmatpush3.msra.mxu1 %v318_v48 }
  0xda   :  { %567 = vmatprep.subr.mxu1 %v613_v1 }
  0xdb   :  { %568 = vmatpush3.msra.mxu1 %v317_v49 }
  0xdc   :  { %569 = vmatprep.subr.mxu1 %v613_v1 }
  0xdd   :  { %570 = vmatpush3.msra.mxu1 %v316_v50 }
  0xde   :  { %571 = vmatprep.subr.mxu1 %v613_v1 }
  0xdf   :  { %572 = vmatpush3.msra.mxu1 %v315_v51 }
  0xe0   :  { %573 = vmatprep.subr.mxu1 %v613_v1 }
  0xe1   :  { %574 = vmatpush3.msra.mxu1 %v314_v52 }
  0xe2   :  { %575 = vmatprep.subr.mxu1 %v613_v1 }
  0xe3   :  { %576 = vmatpush3.msra.mxu1 %v313_v53 }
  0xe4   :  { %577 = vmatprep.subr.mxu1 %v613_v1 }
  0xe5   :  { %578 = vmatpush3.msra.mxu1 %v312_v60 }
  0xe6   :  { %579 = vmatprep.subr.mxu1 %v613_v1 }
  0xe7   :  { %580 = vmatpush3.msra.mxu1 %v311_v61 }
  0xe8   :  { %581 = vmatprep.subr.mxu1 %v613_v1 }
  0xe9   :  { %582 = vmatpush3.msra.mxu1 %v310_v62 }
  0xea   :  { %583 = vmatprep.subr.mxu1 %v613_v1 }
  0xeb   :  { %584 = vmatpush3.msra.mxu1 %v309_v63 }
 0x18c   :  { %v208_v55 = vpop.f32.mrf.mxu1 }
 0x18d   :  { %v209_v56 = vadd.f32 %v419_v54, %v208_v55 }
 0x18e   :  { %v517_v57 = vpop.f32.mrf.mxu1 }
 0x18f   :  { %v212_v58 = vmul.f32 0.2, %v209_v56 }
 0x191   :  { %v213_v59 = vmax.f32 %v209_v56, %v212_v58 }
 0x193   :  { %551 = vmatmul.mubr.f32.vlgmr.msra.gmra.mxu0 %v213_v59 }
 0x253   :  { %v303_v2 = vpop.f32.mrf.mxu0 }
 0x254   :  { %v304_v3 = vadd.f32 %v420_v0, %v303_v2 }
 0x255   :  { %v552_v4 = vpop.f32.mrf.mxu0 }
 0x256   :  { %v307_v5 = vmul.f32 0.2, %v304_v3 }
 0x258   :  { %v308_v6 = vmax.f32 %v304_v3, %v307_v5 }
 0x25a   :  { %586 = vmatmul.mubr.f32.vlgmr.msra.gmra.mxu1 %v308_v6 }
 0x31a   :  { %v398_v1 = vpop.f32.mrf.mxu1 }
 0x31b   :  { %v399_v8 = vadd.f32 %v421_v7, %v398_v1 }
 0x31c   :  { %v587_v9 = vpop.f32.mrf.mxu1 }
 0x31d   :  { %402 = vst [vmem:[#allocation2] sm:$0xff] %v399_v8 }
 0x31e   :  { %602 = shalt.err (!%p599_p4)
}
 0x31f   :  { %412 = dma.vmem_to_hbm [thread:$0]  %s410_s19, 128, %s901_s9, [#allocation3]  }
 0x320   :  { %611 = dma.done.wait [#allocation3], 128  }
 0x321   :  { %612 = vsyncadd [#allocation3], 4294967168 }
 0x322   :  { %416 = vsyncpa [#allocation3], 1 }

</bundles_post_ra>
